<compile_context>
chip_gen: v7x
topology: tpu7x:2x2x1
jax: 0.10.0
libtpu: 0.0.40
codegen_flags: <defaults>
</compile_context>

<pallas_src>
import jax
import jax.numpy as jnp
from jax.experimental import pallas as pl
from jax.experimental.pallas import tpu as pltpu


def _round_up(n, m):
    return ((n + m - 1) // m) * m


def _num_tensorcores():
    """Best-effort TensorCore count per chip (v7x has 2; v5e/v6e have 1)."""
    try:
        kind = jax.devices()[0].device_kind.lower()
    except Exception:
        return 1
    return 2 if ("v7" in kind or "7x" in kind) else 1


# ---------------------------------------------------------------------------
# One-time parameter preparation: BN already folded; pad to lane-dense bf16
# tiles and consolidate the three biases into one small f32 array.
# ---------------------------------------------------------------------------
def prepare_params(params, *, lane=128):
    f_in, hidden = params["w0"].shape
    n_class = params["w2"].shape[1]
    F = _round_up(f_in, lane)
    H = _round_up(hidden, lane)
    C = _round_up(n_class, lane)
    P = max(H, C)

    def pad2(a, rows, cols):
        a = a.astype(jnp.bfloat16)
        return jnp.pad(a, ((0, rows - a.shape[0]), (0, cols - a.shape[1])))

    w0 = pad2(params["w0"], F, H)          # (F, H)   BN0 folded
    w1 = pad2(params["w1"], H, H)          # (H, H)   BN1 folded
    w2 = pad2(params["w2"], H, C)          # (H, C)

    b_all = jnp.zeros((3, P), jnp.float32)
    b_all = b_all.at[0, :hidden].set(params["b0"].reshape(-1))
    b_all = b_all.at[1, :hidden].set(params["b1"].reshape(-1))
    b_all = b_all.at[2, :n_class].set(params["b2"].reshape(-1))

    return {
        "w0": w0, "w1": w1, "w2": w2, "b_all": b_all,
        "dims": (f_in, hidden, n_class, F, H, C, P),
    }


# ---------------------------------------------------------------------------
# Forward: fused 3-layer MLP, one Pallas call, balanced batch tiling.
# ---------------------------------------------------------------------------
def dnn_forward(x, prepared, *, num_cores=None, max_tile=1024):
    """x: (B, nfeature, signal_width) f32. Returns logits (B, nclass) f32."""
    if num_cores is None:
        num_cores = _num_tensorcores()

    f_in, hidden, n_class, F, H, C, P = prepared["dims"]
    w0, w1, w2, b_all = (prepared["w0"], prepared["w1"],
                         prepared["w2"], prepared["b_all"])
    B = x.shape[0]

    # Batch tiling: balanced split across TensorCores; single step on 1-TC
    # chips when the whole batch fits one tile. Rows rounded to 16 (bf16).
    B16 = _round_up(B, 16)
    n_steps = max(num_cores, pl.cdiv(B16, max_tile))
    tm = _round_up(pl.cdiv(B16, n_steps), 16)
    n_steps = pl.cdiv(B16, tm)
    B_pad = n_steps * tm
    grid = (n_steps,)

    # Glue: view(-1, input_shape); Dropout is identity in eval mode.
    # Single bf16 pad (zero rows/cols contribute nothing to the matmuls).
    x2d = x.reshape(B, -1).astype(jnp.bfloat16)
    xp = jnp.pad(x2d, ((0, B_pad - B), (0, F - f_in)))

    def kernel(x_ref, w0_ref, w1_ref, w2_ref, b_ref, o_ref):
        # layer 0: Linear(+folded BN) + ReLU  (bf16 operands, f32 accumulate)
        h = jnp.dot(x_ref[...], w0_ref[...], preferred_element_type=jnp.float32)
        h = jnp.maximum(h + b_ref[0:1, :H], 0.0)
        # layer 1: Linear(+folded BN) + ReLU
        h = jnp.dot(h.astype(jnp.bfloat16), w1_ref[...],
                    preferred_element_type=jnp.float32)
        h = jnp.maximum(h + b_ref[1:2, :H], 0.0)
        # layer 2: final Linear (no activation); lane-dense (C = 128k) store
        h = jnp.dot(h.astype(jnp.bfloat16), w2_ref[...],
                    preferred_element_type=jnp.float32)
        o_ref[...] = (h + b_ref[2:3, :C]).astype(o_ref.dtype)

    full = lambda i: (0, 0)  # weights / biases: same full block every grid step

    flops = 2 * B_pad * (F * H + H * H + H * C)
    bytes_accessed = (B_pad * F * 2                      # x (bf16)
                      + (F * H + H * H + H * C) * 2      # weights (bf16)
                      + 3 * P * 4                        # consolidated biases
                      + B_pad * C * 4)                   # output (f32)

    out_padded = pl.pallas_call(
        kernel,
        out_shape=jax.ShapeDtypeStruct((B_pad, C), jnp.float32),
        grid=grid,
        in_specs=[
            pl.BlockSpec((tm, F), lambda i: (i, 0)),   # x batch tile
            pl.BlockSpec((F, H), full),                # W0 (BN folded)
            pl.BlockSpec((H, H), full),                # W1 (BN folded)
            pl.BlockSpec((H, C), full),                # W2
            pl.BlockSpec((3, P), full),                # consolidated biases
        ],
        out_specs=pl.BlockSpec((tm, C), lambda i: (i, 0)),
        compiler_params=pltpu.CompilerParams(
            dimension_semantics=("parallel",)),
        cost_estimate=pl.CostEstimate(flops=flops, transcendentals=0,
                                      bytes_accessed=bytes_accessed),
    )(xp, w0, w1, w2, b_all)

    return out_padded[:B, :n_class]


# ---------------------------------------------------------------------------
# Deterministic parameter construction (shapes follow DNN.__init__) + BN fold.
# ---------------------------------------------------------------------------
def make_params(key, *, f_in, hidden, n_class, bn_eps=1e-5):
    ks = jax.random.split(key, 10)

    def linear(kw, kb, fin, fout):
        # PyTorch Linear weight is (fout, fin); store transposed as (fin, fout).
        w = jax.random.normal(kw, (fin, fout), jnp.float32) / jnp.sqrt(fin)
        b = 0.1 * jax.random.normal(kb, (1, fout), jnp.float32)
        return w, b

    w0, b0 = linear(ks[0], ks[1], f_in, hidden)
    w1, b1 = linear(ks[2], ks[3], hidden, hidden)
    w2, b2 = linear(ks[4], ks[5], hidden, n_class)

    def bn_fold(w, b, kg, kbeta, fout):
        # Deterministic (non-trivial) BN eval-mode parameters, folded into Linear.
        gamma = 1.0 + 0.05 * jax.random.normal(kg, (fout,), jnp.float32)
        beta = 0.05 * jax.random.normal(kbeta, (fout,), jnp.float32)
        run_mean = jnp.zeros((fout,), jnp.float32)
        run_var = jnp.ones((fout,), jnp.float32)
        scale = gamma / jnp.sqrt(run_var + bn_eps)             # (fout,)
        w_f = w * scale[None, :]
        b_f = (b - run_mean[None, :]) * scale[None, :] + beta[None, :]
        return w_f, b_f

    w0, b0 = bn_fold(w0, b0, ks[6], ks[7], hidden)
    w1, b1 = bn_fold(w1, b1, ks[8], ks[9], hidden)

    return {"w0": w0, "b0": b0, "w1": w1, "b1": b1, "w2": w2, "b2": b2}


def reference_forward(x, params, *, matmul_dtype=jnp.float32):
    """Pure-JAX reference; matmul_dtype=bf16 matches the kernel's compute precision."""
    h = x.reshape(x.shape[0], -1).astype(jnp.float32)

    def lin(h, w, b):
        return jnp.dot(h.astype(matmul_dtype), w.astype(matmul_dtype),
                       preferred_element_type=jnp.float32) + b

    h = jnp.maximum(lin(h, params["w0"], params["b0"]), 0.0)
    h = jnp.maximum(lin(h, params["w1"], params["b1"]), 0.0)
    return lin(h, params["w2"], params["b2"])


if __name__ == "__main__":
    # Config implied by __init__:
    #   nfeature=4, signal_width=8 -> input_shape=32; nchannel=32; nlayer=2 -> 3 layers;
    #   nclass=8; dropout irrelevant in eval. Batch=256: one grid step on v5e/v6e
    #   (single TensorCore), a balanced 2-step "parallel" grid on v7x.
    B, NFEAT, SIGW, HIDDEN, NCLASS = 256, 4, 8, 32, 8
    F_IN = NFEAT * SIGW

    key = jax.random.PRNGKey(0)
    kx, kp = jax.random.split(key)
    x = jax.random.normal(kx, (B, NFEAT, SIGW), jnp.float32)
    params = make_params(kp, f_in=F_IN, hidden=HIDDEN, n_class=NCLASS)

    # One-time padding / bf16 conversion / bias consolidation (hoisted out of forward).
    prepared = prepare_params(params)

    out = dnn_forward(x, prepared)
    out = jax.block_until_ready(out)
    assert out.shape == (B, NCLASS)

    # Primary check: reference with matching bf16 matmul precision (tight tolerance).
    ref_bf16 = reference_forward(x, params, matmul_dtype=jnp.bfloat16)
    assert jnp.allclose(out, ref_bf16, atol=1e-2, rtol=1e-2), "mismatch vs bf16 reference"

    # Sanity check: full-f32 reference (loose tolerance for bf16 operand rounding).
    ref_f32 = reference_forward(x, params, matmul_dtype=jnp.float32)
    assert jnp.allclose(out, ref_f32, atol=1e-1, rtol=1e-1), "mismatch vs f32 reference"

    print("KERNEL_OK")
</pallas_src>

<mosaic_0001>
module attributes {stable_mosaic.version = 11 : i64} {
  func.func @kernel(%arg0: i32, %arg1: memref<256x128xbf16, #tpu.memory_space<vmem>>, %arg2: memref<128x128xbf16, #tpu.memory_space<vmem>>, %arg3: memref<128x128xbf16, #tpu.memory_space<vmem>>, %arg4: memref<128x128xbf16, #tpu.memory_space<vmem>>, %arg5: memref<3x128xf32, #tpu.memory_space<vmem>>, %arg6: memref<256x128xf32, #tpu.memory_space<vmem>>) attributes {dimension_semantics = [#tpu.dimension_semantics<parallel>], iteration_bounds = array<i64: 1>, scalar_prefetch = 0 : i64, scratch_operands = 0 : i64, tpu.core_type = #tpu.core_type<tc>, window_params = [{transform_indices = @transform_0, window_bounds = array<i64: 256, 128>}, {pipeline_mode = #tpu.pipeline_mode<synchronous>, transform_indices = @transform_1, window_bounds = array<i64: 128, 128>}, {pipeline_mode = #tpu.pipeline_mode<synchronous>, transform_indices = @transform_2, window_bounds = array<i64: 128, 128>}, {pipeline_mode = #tpu.pipeline_mode<synchronous>, transform_indices = @transform_3, window_bounds = array<i64: 128, 128>}, {pipeline_mode = #tpu.pipeline_mode<synchronous>, transform_indices = @transform_4, window_bounds = array<i64: 3, 128>}, {transform_indices = @transform_5, window_bounds = array<i64: 256, 128>}]} {
    %c0 = arith.constant 0 : index
    %c0_0 = arith.constant 0 : index
    %0 = vector.load %arg1[%c0, %c0_0] : memref<256x128xbf16, #tpu.memory_space<vmem>>, vector<256x128xbf16>
    %c0_1 = arith.constant 0 : index
    %c0_2 = arith.constant 0 : index
    %1 = vector.load %arg2[%c0_1, %c0_2] : memref<128x128xbf16, #tpu.memory_space<vmem>>, vector<128x128xbf16>
    %cst = arith.constant dense<0.000000e+00> : vector<256x128xf32>
    %2 = tpu.matmul %0, %1, %cst {dimension_numbers = #tpu.dot_dimension_numbers<[1], [0], [0], [1], [0, 0, 1, 1], [], []>} : vector<256x128xbf16>, vector<128x128xbf16>, vector<256x128xf32> -> vector<256x128xf32>
    %c0_3 = arith.constant 0 : index
    %c0_4 = arith.constant 0 : index
    %3 = vector.load %arg5[%c0_3, %c0_4] : memref<3x128xf32, #tpu.memory_space<vmem>>, vector<1x128xf32>
    %4 = vector.broadcast %3 : vector<1x128xf32> to vector<256x128xf32>
    %5 = arith.addf %2, %4 : vector<256x128xf32>
    %cst_5 = arith.constant 0.000000e+00 : f32
    %6 = vector.broadcast %cst_5 : f32 to vector<256x128xf32>
    %7 = arith.maximumf %5, %6 : vector<256x128xf32>
    %8 = arith.truncf %7 : vector<256x128xf32> to vector<256x128xbf16>
    %c0_6 = arith.constant 0 : index
    %c0_7 = arith.constant 0 : index
    %9 = vector.load %arg3[%c0_6, %c0_7] : memref<128x128xbf16, #tpu.memory_space<vmem>>, vector<128x128xbf16>
    %cst_8 = arith.constant dense<0.000000e+00> : vector<256x128xf32>
    %10 = tpu.matmul %8, %9, %cst_8 {dimension_numbers = #tpu.dot_dimension_numbers<[1], [0], [0], [1], [0, 0, 1, 1], [], []>} : vector<256x128xbf16>, vector<128x128xbf16>, vector<256x128xf32> -> vector<256x128xf32>
    %c1 = arith.constant 1 : index
    %c0_9 = arith.constant 0 : index
    %11 = vector.load %arg5[%c1, %c0_9] : memref<3x128xf32, #tpu.memory_space<vmem>>, vector<1x128xf32>
    %12 = vector.broadcast %11 : vector<1x128xf32> to vector<256x128xf32>
    %13 = arith.addf %10, %12 : vector<256x128xf32>
    %cst_10 = arith.constant 0.000000e+00 : f32
    %14 = vector.broadcast %cst_10 : f32 to vector<256x128xf32>
    %15 = arith.maximumf %13, %14 : vector<256x128xf32>
    %16 = arith.truncf %15 : vector<256x128xf32> to vector<256x128xbf16>
    %c0_11 = arith.constant 0 : index
    %c0_12 = arith.constant 0 : index
    %17 = vector.load %arg4[%c0_11, %c0_12] : memref<128x128xbf16, #tpu.memory_space<vmem>>, vector<128x128xbf16>
    %cst_13 = arith.constant dense<0.000000e+00> : vector<256x128xf32>
    %18 = tpu.matmul %16, %17, %cst_13 {dimension_numbers = #tpu.dot_dimension_numbers<[1], [0], [0], [1], [0, 0, 1, 1], [], []>} : vector<256x128xbf16>, vector<128x128xbf16>, vector<256x128xf32> -> vector<256x128xf32>
    %c2 = arith.constant 2 : index
    %c0_14 = arith.constant 0 : index
    %19 = vector.load %arg5[%c2, %c0_14] : memref<3x128xf32, #tpu.memory_space<vmem>>, vector<1x128xf32>
    %20 = vector.broadcast %19 : vector<1x128xf32> to vector<256x128xf32>
    %21 = arith.addf %18, %20 : vector<256x128xf32>
    %c0_15 = arith.constant 0 : index
    %c0_16 = arith.constant 0 : index
    %22 = vector.load %arg6[%c0_15, %c0_16] : memref<256x128xf32, #tpu.memory_space<vmem>>, vector<256x128xf32>
    tpu.vector_store %arg6[%c0_15, %c0_16], %21 {strides = array<i32>} : memref<256x128xf32, #tpu.memory_space<vmem>>, vector<256x128xf32>,
    return
  }
  func.func @transform_0(%arg0: i32) -> (i32, i32) {
    %c0_i32 = arith.constant 0 : i32
    %c0_i32_0 = arith.constant 0 : i32
    return %arg0, %c0_i32 : i32, i32
  }
  func.func @transform_1(%arg0: i32) -> (i32, i32) {
    %c0_i32 = arith.constant 0 : i32
    %c0_i32_0 = arith.constant 0 : i32
    %c0_i32_1 = arith.constant 0 : i32
    return %c0_i32, %c0_i32_0 : i32, i32
  }
  func.func @transform_2(%arg0: i32) -> (i32, i32) {
    %c0_i32 = arith.constant 0 : i32
    %c0_i32_0 = arith.constant 0 : i32
    %c0_i32_1 = arith.constant 0 : i32
    return %c0_i32, %c0_i32_0 : i32, i32
  }
  func.func @transform_3(%arg0: i32) -> (i32, i32) {
    %c0_i32 = arith.constant 0 : i32
    %c0_i32_0 = arith.constant 0 : i32
    %c0_i32_1 = arith.constant 0 : i32
    return %c0_i32, %c0_i32_0 : i32, i32
  }
  func.func @transform_4(%arg0: i32) -> (i32, i32) {
    %c0_i32 = arith.constant 0 : i32
    %c0_i32_0 = arith.constant 0 : i32
    %c0_i32_1 = arith.constant 0 : i32
    return %c0_i32, %c0_i32_0 : i32, i32
  }
  func.func @transform_5(%arg0: i32) -> (i32, i32) {
    %c0_i32 = arith.constant 0 : i32
    %c0_i32_0 = arith.constant 0 : i32
    return %arg0, %c0_i32 : i32, i32
  }
}

</mosaic_0001>

<bundles_post_ra>
// kernel: tpu_custom_call.1
= control target key start
LH: loop header
LB: loop body
LE: loop exit
PB: predicated region body
PF: predicated region fallthrough
CT: control target
= control target key end

     0   :  { %10 = vsyncpa [#allocation3], 0  ;;  %s1732_s0 = inlined_call_operand.hbm [shape: bf16[256,128], index: 0, kind: input, shape index: {}]   ;;  %s1733_s1 = inlined_call_operand.hbm [shape: bf16[128,128], index: 1, kind: input, shape index: {}]   ;;  %s1734_s2 = inlined_call_operand.hbm [shape: bf16[128,128], index: 2, kind: input, shape index: {}]   ;;  %s1735_s3 = inlined_call_operand.hbm [shape: bf16[128,128], index: 3, kind: input, shape index: {}]   ;;  %s1736_s4 = inlined_call_operand.vmem [shape: f32[3,128], index: 4, kind: input, shape index: {}]   ;;  %s1737_s5 = inlined_call_operand.hbm [shape: f32[256,128], index: 5, kind: output, shape index: {}]  }
   0x1   :  { %11 = vsyncpa [#allocation6], 0 }
   0x2   :  { %12 = vsyncpa [#allocation9], 0 }
   0x3   :  { %13 = vsyncpa [#allocation4], 0  ;;  %s1484_s18 = smov [#allocation5]   ;;  %s1485_s20 = smov [#allocation2]  }
   0x4   :  { %s31_s19 = sshll.u32 %s1484_s18, 4  ;;  %s19_s21 = sshll.u32 %s1485_s20, 4  ;;  %s32_s19 = int_to_ptr.vmem [resolvable:$true] %s31_s19  ;;  %s1523_s21 = int_to_ptr.vmem [resolvable:$true] %s19_s21 }
   0x5   :  { %s1366_s24 = scalar_lea.hbm %s1733_s1, 1024 }
   0x6   :  { %p1367_p0 = scmp.ne.s32.totalorder %s1733_s1, %s1366_s24  ;;  %p1370_p1 = scmp.lt.u32.totalorder %s1366_s24, %s1733_s1 }
   0x8   :  { %p1372_p2 = pnand %p1370_p1, %p1367_p0 }
   0xa   :  { %1375 = shalt.err (!%p1372_p2)
}
   0xb   :  { %s1376_s29 = scalar_lea.vmem %s32_s19, 1024  ;;  %p1381_p4 = scmp.lt.s32.totalorder %s32_s19, %s32_s19 }
   0xc   :  { %p1377_p3 = scmp.ne.s32.totalorder %s32_s19, %s1376_s29  ;;  %p1382_p5 = scmp.lt.s32.totalorder %s1376_s29, %s1376_s29 }
   0xe   :  { %p1383_p6 = por %p1382_p5, %p1381_p4 }
  0x10   :  { %p1384_p7 = pnand %p1383_p6, %p1377_p3 }
  0x12   :  { %1387 = shalt.err (!%p1384_p7)
}
  0x13   :  { %s1486_s30 = smov 64   ;;  %s1487_s6 = smov 4  }
  0x14   :  { %37 = dma.hbm_to_vmem [thread:$0]  %s1733_s1, 1024, %s32_s19, [#allocation6], %s1486_s30, %s1486_s30, %s1487_s6  }
  0x15   :  { %s1388_s11 = scalar_lea.hbm %s1732_s0, 2048 }
  0x16   :  { %p1389_p8 = scmp.ne.s32.totalorder %s1732_s0, %s1388_s11  ;;  %p1392_p9 = scmp.lt.u32.totalorder %s1388_s11, %s1732_s0 }
  0x18   :  { %p1394_p10 = pnand %p1392_p9, %p1389_p8 }
  0x1a   :  { %1397 = shalt.err (!%p1394_p10)
}
  0x1b   :  { %s1398_s16 = scalar_lea.vmem %s1523_s21, 2048  ;;  %p1403_p12 = scmp.lt.s32.totalorder %s1523_s21, %s1523_s21 }
  0x1c   :  { %p1399_p11 = scmp.ne.s32.totalorder %s1523_s21, %s1398_s16  ;;  %p1404_p13 = scmp.lt.s32.totalorder %s1398_s16, %s1398_s16 }
  0x1e   :  { %p1405_p0 = por %p1404_p13, %p1403_p12 }
  0x20   :  { %p1406_p1 = pnand %p1405_p0, %p1399_p11 }
  0x22   :  { %1409 = shalt.err (!%p1406_p1)
}
  0x23   :  { %25 = dma.hbm_to_vmem [thread:$0]  %s1732_s0, 2048, %s1523_s21, [#allocation3], %s1486_s30, %s1486_s30, %s1487_s6  }
  0x24   :  { %s1488_s18 = smov [#allocation7]   ;;  %s1489_s20 = smov [#allocation8]  }
  0x25   :  { %s43_s19 = sshll.u32 %s1488_s18, 4  ;;  %s55_s22 = sshll.u32 %s1489_s20, 4  ;;  %s44_s19 = int_to_ptr.vmem [resolvable:$true] %s43_s19  ;;  %s1560_s22 = int_to_ptr.vmem [resolvable:$true] %s55_s22 }
  0x26   :  { %s1410_s25 = scalar_lea.hbm %s1734_s2, 1024 }
  0x27   :  { %p1411_p2 = scmp.ne.s32.totalorder %s1734_s2, %s1410_s25  ;;  %p1414_p3 = scmp.lt.u32.totalorder %s1410_s25, %s1734_s2 }
  0x29   :  { %p1416_p4 = pnand %p1414_p3, %p1411_p2 }
  0x2b   :  { %1419 = shalt.err (!%p1416_p4)
}
  0x2c   :  { %s1420_s0 = scalar_lea.vmem %s44_s19, 1024  ;;  %p1425_p6 = scmp.lt.s32.totalorder %s44_s19, %s44_s19 }
  0x2d   :  { %p1421_p5 = scmp.ne.s32.totalorder %s44_s19, %s1420_s0  ;;  %p1426_p7 = scmp.lt.s32.totalorder %s1420_s0, %s1420_s0 }
  0x2f   :  { %p1427_p8 = por %p1426_p7, %p1425_p6 }
  0x31   :  { %p1428_p9 = pnand %p1427_p8, %p1421_p5 }
  0x33   :  { %1431 = shalt.err (!%p1428_p9)
}
  0x34   :  { %49 = dma.hbm_to_vmem [thread:$0]  %s1734_s2, 1024, %s44_s19, [#allocation6], %s1486_s30, %s1486_s30, %s1487_s6  }
  0x35   :  { %s1432_s10 = scalar_lea.hbm %s1735_s3, 1024 }
  0x36   :  { %p1433_p10 = scmp.ne.s32.totalorder %s1735_s3, %s1432_s10  ;;  %p1436_p11 = scmp.lt.u32.totalorder %s1432_s10, %s1735_s3 }
  0x38   :  { %p1438_p12 = pnand %p1436_p11, %p1433_p10 }
  0x3a   :  { %1441 = shalt.err (!%p1438_p12)
}
  0x3b   :  { %s1442_s15 = scalar_lea.vmem %s1560_s22, 1024  ;;  %p1447_p0 = scmp.lt.s32.totalorder %s1560_s22, %s1560_s22 }
  0x3c   :  { %p1443_p13 = scmp.ne.s32.totalorder %s1560_s22, %s1442_s15  ;;  %p1448_p1 = scmp.lt.s32.totalorder %s1442_s15, %s1442_s15 }
  0x3e   :  { %p1449_p2 = por %p1448_p1, %p1447_p0 }
  0x40   :  { %p1450_p3 = pnand %p1449_p2, %p1443_p13 }
  0x42   :  { %1453 = shalt.err (!%p1450_p3)
}
  0x43   :  { %61 = dma.hbm_to_vmem [thread:$0]  %s1735_s3, 1024, %s1560_s22, [#allocation9], %s1486_s30, %s1486_s30, %s1487_s6  }
  0x44   :  { %1476 = dma.done.wait [#allocation3], 2048  }
  0x45   :  { %1477 = vsyncadd [#allocation3], 4294965248 }
  0x46   :  { %1478 = dma.done.wait [#allocation6], 2048  }
  0x47   :  { %1479 = vsyncadd [#allocation6], 4294965248 }
  0x48   :  { %1480 = dma.done.wait [#allocation9], 1024  }
  0x49   :  { %1481 = vsyncadd [#allocation9], 4294966272  ;;  %v1326_v0 = vld [vmem:[#allocation5] sm:$0xff]   ;;  %v1327_v1 = vld [vmem:[#allocation5 + $0x8] sm:$0xff]  }
  0x4a   :  { %1157 = vmatprep.subr.bf16.mxu0 %v1326_v0  ;;  %1301 = vmatprep.subr.bf16.mxu1 %v1326_v0  ;;  %v1328_v2 = vld [vmem:[#allocation5 + $0x10] sm:$0xff]   ;;  %v1329_v3 = vld [vmem:[#allocation5 + $0x18] sm:$0xff]   ;;  %v1334_v4 = vld [vmem:[#allocation2] sm:$0xff]  }
  0x4b   :  { %1158 = vmatpush3.bf16.msra.mxu0 %v1326_v0  ;;  %1309 = vmatpush3.bf16.msra.mxu1 %v1326_v0  ;;  %v1330_v5 = vld [vmem:[#allocation5 + $0x20] sm:$0xff]   ;;  %v1331_v6 = vld [vmem:[#allocation5 + $0x28] sm:$0xff]   ;;  %v1332_v8 = vld [vmem:[#allocation5 + $0x30] sm:$0xff]  }
  0x4c   :  { %1159 = vmatprep.subr.bf16.mxu0 %v1327_v1  ;;  %1302 = vmatprep.subr.bf16.mxu1 %v1327_v1  ;;  %v1342_v7 = vld [vmem:[#allocation2 + $0x40] sm:$0xff]   ;;  %v1333_v9 = vld [vmem:[#allocation5 + $0x38] sm:$0xff]   ;;  %v1335_v10 = vld [vmem:[#allocation2 + $0x8] sm:$0xff]  }
  0x4d   :  { %1173 = vmatprep.mubr.bf16.mxu0 %v1334_v4  ;;  %1189 = vmatprep.mubr.bf16.mxu1 %v1342_v7  ;;  %v1343_v11 = vld [vmem:[#allocation2 + $0x48] sm:$0xff]   ;;  %v1350_v12 = vld [vmem:[#allocation7] sm:$0xff]   ;;  %v1336_v13 = vld [vmem:[#allocation2 + $0x10] sm:$0xff]  }
  0x4e   :  { %v1344_v14 = vld [vmem:[#allocation2 + $0x50] sm:$0xff]   ;;  %v1351_v15 = vld [vmem:[#allocation7 + $0x8] sm:$0xff]   ;;  %v1337_v17 = vld [vmem:[#allocation2 + $0x18] sm:$0xff]  }
  0x4f   :  { %1160 = vmatpush3.bf16.msra.mxu0 %v1327_v1  ;;  %1310 = vmatpush3.bf16.msra.mxu1 %v1327_v1  ;;  %v1352_v16 = vld [vmem:[#allocation7 + $0x10] sm:$0xff]   ;;  %v1345_v18 = vld [vmem:[#allocation2 + $0x58] sm:$0xff]   ;;  %v1338_v19 = vld [vmem:[#allocation2 + $0x20] sm:$0xff]  }
  0x50   :  { %1161 = vmatprep.subr.bf16.mxu0 %v1328_v2  ;;  %1303 = vmatprep.subr.bf16.mxu1 %v1328_v2  ;;  %v1346_v20 = vld [vmem:[#allocation2 + $0x60] sm:$0xff]   ;;  %v1353_v21 = vld [vmem:[#allocation7 + $0x18] sm:$0xff]   ;;  %v1339_v23 = vld [vmem:[#allocation2 + $0x28] sm:$0xff]  }
  0x51   :  { %v1354_v22 = vld [vmem:[#allocation7 + $0x20] sm:$0xff]   ;;  %v1347_v24 = vld [vmem:[#allocation2 + $0x68] sm:$0xff]   ;;  %v1340_v25 = vld [vmem:[#allocation2 + $0x30] sm:$0xff]  }
  0x52   :  { %v1348_v26 = vld [vmem:[#allocation2 + $0x70] sm:$0xff]   ;;  %v1355_v27 = vld [vmem:[#allocation7 + $0x28] sm:$0xff]   ;;  %v1341_v28 = vld [vmem:[#allocation2 + $0x38] sm:$0xff]  }
  0x53   :  { %1162 = vmatpush3.bf16.msra.mxu0 %v1328_v2  ;;  %1311 = vmatpush3.bf16.msra.mxu1 %v1328_v2  ;;  %v1349_v29 = vld [vmem:[#allocation2 + $0x78] sm:$0xff]   ;;  %v1356_v30 = vld [vmem:[#allocation7 + $0x30] sm:$0xff]   ;;  %v1358_v32 = vld [vmem:[#allocation8] sm:$0xff]  }
  0x54   :  { %1163 = vmatprep.subr.bf16.mxu0 %v1329_v3  ;;  %1304 = vmatprep.subr.bf16.mxu1 %v1329_v3  ;;  %v1357_v31 = vld [vmem:[#allocation7 + $0x38] sm:$0xff]   ;;  %v1359_v33 = vld [vmem:[#allocation8 + $0x8] sm:$0xff]   ;;  %v1360_v34 = vld [vmem:[#allocation8 + $0x10] sm:$0xff]  }
  0x55   :  { %v1361_v35 = vld [vmem:[#allocation8 + $0x18] sm:$0xff]   ;;  %v1362_v36 = vld [vmem:[#allocation8 + $0x20] sm:$0xff]   ;;  %v1363_v37 = vld [vmem:[#allocation8 + $0x28] sm:$0xff]  }
  0x56   :  { %v1600_v38 = vld [vmem:[%s1736_s4] ss:$0 sm:$0xff] }
  0x57   :  { %1164 = vmatpush3.bf16.msra.mxu0 %v1329_v3  ;;  %1312 = vmatpush3.bf16.msra.mxu1 %v1329_v3 }
  0x58   :  { %1165 = vmatprep.subr.bf16.mxu0 %v1330_v5  ;;  %1305 = vmatprep.subr.bf16.mxu1 %v1330_v5 }
  0x5b   :  { %1166 = vmatpush3.bf16.msra.mxu0 %v1330_v5  ;;  %1313 = vmatpush3.bf16.msra.mxu1 %v1330_v5 }
  0x5c   :  { %1167 = vmatprep.subr.bf16.mxu0 %v1331_v6  ;;  %1306 = vmatprep.subr.bf16.mxu1 %v1331_v6 }
  0x5f   :  { %1168 = vmatpush3.bf16.msra.mxu0 %v1331_v6  ;;  %1314 = vmatpush3.bf16.msra.mxu1 %v1331_v6 }
  0x60   :  { %1169 = vmatprep.subr.bf16.mxu0 %v1332_v8  ;;  %1307 = vmatprep.subr.bf16.mxu1 %v1332_v8 }
  0x63   :  { %1170 = vmatpush3.bf16.msra.mxu0 %v1332_v8  ;;  %1315 = vmatpush3.bf16.msra.mxu1 %v1332_v8 }
  0x64   :  { %1171 = vmatprep.subr.bf16.mxu0 %v1333_v9  ;;  %1308 = vmatprep.subr.bf16.mxu1 %v1333_v9 }
  0x67   :  { %1172 = vmatpush3.bf16.msra.mxu0 %v1333_v9  ;;  %1316 = vmatpush3.bf16.msra.mxu1 %v1333_v9 }
  0x68   :  { %1205 = vmatprep.subr.bf16.mxu1 %v1350_v12  ;;  %1253 = vmatprep.subr.bf16.mxu0 %v1358_v32 }
  0x6a   :  { %1174 = vmatmul.mubr.bf16.vlgmr.msra.gmra.mrb[0].mxu0 %v1335_v10  ;;  %1190 = vmatmul.mubr.bf16.vlgmr.msra.gmra.mrb[0].mxu1 %v1343_v11 }
  0x6b   :  { %1177 = vmatprep.mubr.bf16.mxu0 %v1336_v13  ;;  %1193 = vmatprep.mubr.bf16.mxu1 %v1344_v14 }
  0x6c   :  { %1206 = vmatpush3.bf16.msra.mxu1 %v1350_v12  ;;  %1254 = vmatpush3.bf16.msra.mxu0 %v1358_v32 }
  0x6d   :  { %1207 = vmatprep.subr.bf16.mxu1 %v1351_v15  ;;  %1255 = vmatprep.subr.bf16.mxu0 %v1359_v33 }
  0x70   :  { %1208 = vmatpush3.bf16.msra.mxu1 %v1351_v15  ;;  %1256 = vmatpush3.bf16.msra.mxu0 %v1359_v33 }
  0x71   :  { %1209 = vmatprep.subr.bf16.mxu1 %v1352_v16  ;;  %1257 = vmatprep.subr.bf16.mxu0 %v1360_v34 }
  0x72   :  { %1178 = vmatmul.mubr.bf16.gmra.mrb[4].mxu0 %v1337_v17  ;;  %1194 = vmatmul.mubr.bf16.gmra.mrb[4].mxu1 %v1345_v18 }
  0x73   :  { %1181 = vmatprep.mubr.bf16.mxu0 %v1338_v19  ;;  %1197 = vmatprep.mubr.bf16.mxu1 %v1346_v20 }
  0x74   :  { %1210 = vmatpush3.bf16.msra.mxu1 %v1352_v16  ;;  %1258 = vmatpush3.bf16.msra.mxu0 %v1360_v34 }
  0x75   :  { %1211 = vmatprep.subr.bf16.mxu1 %v1353_v21  ;;  %1259 = vmatprep.subr.bf16.mxu0 %v1361_v35 }
  0x78   :  { %1212 = vmatpush3.bf16.msra.mxu1 %v1353_v21  ;;  %1260 = vmatpush3.bf16.msra.mxu0 %v1361_v35 }
  0x79   :  { %1213 = vmatprep.subr.bf16.mxu1 %v1354_v22  ;;  %1261 = vmatprep.subr.bf16.mxu0 %v1362_v36 }
  0x7a   :  { %1182 = vmatmul.mubr.bf16.gmra.mrb[8].mxu0 %v1339_v23  ;;  %1198 = vmatmul.mubr.bf16.gmra.mrb[8].mxu1 %v1347_v24 }
  0x7b   :  { %1185 = vmatprep.mubr.bf16.mxu0 %v1340_v25  ;;  %1201 = vmatprep.mubr.bf16.mxu1 %v1348_v26 }
  0x7c   :  { %1214 = vmatpush3.bf16.msra.mxu1 %v1354_v22  ;;  %1262 = vmatpush3.bf16.msra.mxu0 %v1362_v36 }
  0x7d   :  { %1215 = vmatprep.subr.bf16.mxu1 %v1355_v27  ;;  %1263 = vmatprep.subr.bf16.mxu0 %v1363_v37 }
  0x80   :  { %1216 = vmatpush3.bf16.msra.mxu1 %v1355_v27  ;;  %1264 = vmatpush3.bf16.msra.mxu0 %v1363_v37 }
  0x81   :  { %1217 = vmatprep.subr.bf16.mxu1 %v1356_v30 }
  0x82   :  { %1186 = vmatmul.mubr.bf16.gmra.mrb[12].mxu0 %v1341_v28  ;;  %1202 = vmatmul.mubr.bf16.gmra.mrb[12].mxu1 %v1349_v29 }
  0x84   :  { %1218 = vmatpush3.bf16.msra.mxu1 %v1356_v30 }
  0x85   :  { %1219 = vmatprep.subr.bf16.mxu1 %v1357_v31 }
  0x88   :  { %1220 = vmatpush3.bf16.msra.mxu1 %v1357_v31 }
 0x13d   :  { %v1175_v39 = vpop.f32.mrb[0].mxu0  ;;  %v1191_v40 = vpop.f32.mrb[0].mxu1 }
 0x13e   :  { %v317_v41 = vadd.f32 %v1175_v39, %v1600_v38  ;;  %v308_v42 = vpop.f32.mrb[1].mxu0  ;;  %v381_v43 = vadd.f32 %v1191_v40, %v1600_v38  ;;  %v372_v44 = vpop.f32.mrb[1].mxu1 }
 0x13f   :  { %v309_v45 = vadd.f32 %v1600_v38, %v308_v42  ;;  %v1176_v46 = vpop.f32.mrb[2].mxu0  ;;  %v373_v47 = vadd.f32 %v1600_v38, %v372_v44  ;;  %v1192_v48 = vpop.f32.mrb[2].mxu1 }
 0x140   :  { %v320_v49 = vadd.f32 %v1176_v46, %v1600_v38  ;;  %v311_v50 = vpop.f32.mrb[3].mxu0  ;;  %v453_v51 = vmax.f32 %v381_v43, 0.0  ;;  %v384_v52 = vadd.f32 %v1192_v48, %v1600_v38  ;;  %v375_v53 = vpop.f32.mrb[3].mxu1  ;;  %v437_v57 = vmax.f32 %v317_v41, 0.0 }
 0x141   :  { %v312_v54 = vadd.f32 %v1600_v38, %v311_v50  ;;  %v451_v55 = vmax.f32 %v373_v47, 0.0  ;;  %v376_v56 = vadd.f32 %v1600_v38, %v375_v53  ;;  %v435_v60 = vmax.f32 %v309_v45, 0.0 }
 0x142   :  { %v438_v58 = vmax.f32 %v320_v49, 0.0  ;;  %v454_v59 = vmax.f32 %v384_v52, 0.0 }
 0x143   :  { %v436_v61 = vmax.f32 %v312_v54, 0.0  ;;  %v452_v62 = vmax.f32 %v376_v56, 0.0 }
 0x144   :  { %v468_v63 = vpack.c.bf16 %v438_v58, %v437_v57  ;;  %v1610_v0 = vpack.c.bf16 %v454_v59, %v453_v51 }
 0x145   :  { %v467_v1 = vpack.c.bf16 %v436_v61, %v435_v60  ;;  %v1179_v2 = vpop.f32.mrb[4].mxu0  ;;  %v1612_v3 = vpack.c.bf16 %v452_v62, %v451_v55  ;;  %v1195_v4 = vpop.f32.mrb[4].mxu1 }
 0x146   :  { %v333_v5 = vadd.f32 %v1179_v2, %v1600_v38  ;;  %v324_v6 = vpop.f32.mrb[5].mxu0  ;;  %v397_v7 = vadd.f32 %v1195_v4, %v1600_v38  ;;  %v388_v8 = vpop.f32.mrb[5].mxu1 }
 0x147   :  { %v325_v9 = vadd.f32 %v1600_v38, %v324_v6  ;;  %v1180_v10 = vpop.f32.mrb[6].mxu0  ;;  %1221 = vmatprep.mubr.bf16.mxu1 %v467_v1  ;;  %v389_v11 = vadd.f32 %v1600_v38, %v388_v8  ;;  %v1196_v12 = vpop.f32.mrb[6].mxu1 }
 0x148   :  { %v336_v13 = vadd.f32 %v1180_v10, %v1600_v38  ;;  %v327_v14 = vpop.f32.mrb[7].mxu0  ;;  %1222 = vmatmul.mubr.bf16.vlgmr.msra.gmra.mrb[16].mxu1 %v468_v63  ;;  %v457_v15 = vmax.f32 %v397_v7, 0.0  ;;  %v400_v16 = vadd.f32 %v1196_v12, %v1600_v38  ;;  %v391_v17 = vpop.f32.mrb[7].mxu1  ;;  %v441_v21 = vmax.f32 %v333_v5, 0.0 }
 0x149   :  { %v328_v18 = vadd.f32 %v1600_v38, %v327_v14  ;;  %v455_v19 = vmax.f32 %v389_v11, 0.0  ;;  %v392_v20 = vadd.f32 %v1600_v38, %v391_v17  ;;  %v439_v24 = vmax.f32 %v325_v9, 0.0 }
 0x14a   :  { %v442_v22 = vmax.f32 %v336_v13, 0.0  ;;  %v458_v23 = vmax.f32 %v400_v16, 0.0 }
 0x14b   :  { %v440_v25 = vmax.f32 %v328_v18, 0.0  ;;  %v456_v26 = vmax.f32 %v392_v20, 0.0 }
 0x14c   :  { %v470_v27 = vpack.c.bf16 %v442_v22, %v441_v21  ;;  %v1622_v28 = vpack.c.bf16 %v458_v23, %v457_v15 }
 0x14d   :  { %v469_v29 = vpack.c.bf16 %v440_v25, %v439_v24  ;;  %v1183_v30 = vpop.f32.mrb[8].mxu0  ;;  %v1624_v31 = vpack.c.bf16 %v456_v26, %v455_v19  ;;  %v1199_v32 = vpop.f32.mrb[8].mxu1  ;;  %v1365_v26 = vld [vmem:[#allocation8 + $0x38] sm:$0xff]  }
 0x14e   :  { %v349_v33 = vadd.f32 %v1183_v30, %v1600_v38  ;;  %v340_v34 = vpop.f32.mrb[9].mxu0  ;;  %v413_v35 = vadd.f32 %v1199_v32, %v1600_v38  ;;  %v404_v36 = vpop.f32.mrb[9].mxu1 }
 0x14f   :  { %v341_v37 = vadd.f32 %v1600_v38, %v340_v34  ;;  %v1184_v39 = vpop.f32.mrb[10].mxu0  ;;  %1225 = vmatprep.mubr.bf16.mxu1 %v469_v29  ;;  %v405_v40 = vadd.f32 %v1600_v38, %v404_v36  ;;  %v1200_v41 = vpop.f32.mrb[10].mxu1 }
 0x150   :  { %v352_v42 = vadd.f32 %v1184_v39, %v1600_v38  ;;  %v343_v43 = vpop.f32.mrb[11].mxu0  ;;  %1226 = vmatmul.mubr.bf16.gmra.mrb[20].mxu1 %v470_v27  ;;  %v461_v44 = vmax.f32 %v413_v35, 0.0  ;;  %v416_v45 = vadd.f32 %v1200_v41, %v1600_v38  ;;  %v407_v46 = vpop.f32.mrb[11].mxu1  ;;  %v445_v50 = vmax.f32 %v349_v33, 0.0 }
 0x151   :  { %v344_v47 = vadd.f32 %v1600_v38, %v343_v43  ;;  %v459_v48 = vmax.f32 %v405_v40, 0.0  ;;  %v408_v49 = vadd.f32 %v1600_v38, %v407_v46  ;;  %v443_v53 = vmax.f32 %v341_v37, 0.0 }
 0x152   :  { %v446_v51 = vmax.f32 %v352_v42, 0.0  ;;  %v462_v52 = vmax.f32 %v416_v45, 0.0 }
 0x153   :  { %v444_v54 = vmax.f32 %v344_v47, 0.0  ;;  %v460_v55 = vmax.f32 %v408_v49, 0.0 }
 0x154   :  { %v472_v56 = vpack.c.bf16 %v446_v51, %v445_v50  ;;  %v480_v57 = vpack.c.bf16 %v462_v52, %v461_v44 }
 0x155   :  { %v471_v58 = vpack.c.bf16 %v444_v54, %v443_v53  ;;  %v1187_v59 = vpop.f32.mrb[12].mxu0  ;;  %v479_v60 = vpack.c.bf16 %v460_v55, %v459_v48  ;;  %v1203_v61 = vpop.f32.mrb[12].mxu1 }
 0x156   :  { %v365_v62 = vadd.f32 %v1187_v59, %v1600_v38  ;;  %v356_v63 = vpop.f32.mrb[13].mxu0  ;;  %v429_v1 = vadd.f32 %v1203_v61, %v1600_v38  ;;  %v420_v2 = vpop.f32.mrb[13].mxu1 }
 0x157   :  { %v357_v4 = vadd.f32 %v1600_v38, %v356_v63  ;;  %v1188_v5 = vpop.f32.mrb[14].mxu0  ;;  %1229 = vmatprep.mubr.bf16.mxu1 %v471_v58  ;;  %v421_v6 = vadd.f32 %v1600_v38, %v420_v2  ;;  %v1204_v7 = vpop.f32.mrb[14].mxu1 }
 0x158   :  { %v368_v8 = vadd.f32 %v1188_v5, %v1600_v38  ;;  %v359_v9 = vpop.f32.mrb[15].mxu0  ;;  %1230 = vmatmul.mubr.bf16.gmra.mrb[24].mxu1 %v472_v56  ;;  %v465_v10 = vmax.f32 %v429_v1, 0.0  ;;  %v432_v11 = vadd.f32 %v1204_v7, %v1600_v38  ;;  %v423_v12 = vpop.f32.mrb[15].mxu1  ;;  %v449_v16 = vmax.f32 %v365_v62, 0.0 }
 0x159   :  { %v360_v13 = vadd.f32 %v1600_v38, %v359_v9  ;;  %v463_v14 = vmax.f32 %v421_v6, 0.0  ;;  %v424_v15 = vadd.f32 %v1600_v38, %v423_v12  ;;  %v447_v19 = vmax.f32 %v357_v4, 0.0  ;;  %v1364_v38 = vld [vmem:[#allocation8 + $0x30] sm:$0xff]  }
 0x15a   :  { %v450_v17 = vmax.f32 %v368_v8, 0.0  ;;  %v466_v18 = vmax.f32 %v432_v11, 0.0  ;;  %1265 = vmatprep.subr.bf16.mxu0 %v1364_v38 }
 0x15b   :  { %v448_v20 = vmax.f32 %v360_v13, 0.0  ;;  %v464_v21 = vmax.f32 %v424_v15, 0.0  ;;  %1266 = vmatpush3.bf16.msra.mxu0 %v1364_v38 }
 0x15c   :  { %v474_v22 = vpack.c.bf16 %v450_v17, %v449_v16  ;;  %v482_v23 = vpack.c.bf16 %v466_v18, %v465_v10  ;;  %1267 = vmatprep.subr.bf16.mxu0 %v1365_v26 }
 0x15d   :  { %v473_v24 = vpack.c.bf16 %v448_v20, %v447_v19  ;;  %v481_v25 = vpack.c.bf16 %v464_v21, %v463_v14 }
 0x15f   :  { %1233 = vmatprep.mubr.bf16.mxu1 %v473_v24  ;;  %1268 = vmatpush3.bf16.msra.mxu0 %v1365_v26 }
 0x160   :  { %1234 = vmatmul.mubr.bf16.gmra.mrb[28].mxu1 %v474_v22 }
 0x161   :  { %1237 = vmatprep.mubr.bf16.mxu1 %v1612_v3  ;;  %v1649_v3 = vld [vmem:[%s1736_s4 + $0x1] ss:$0 sm:$0xff] }
 0x168   :  { %1238 = vmatmul.mubr.bf16.gmra.mrb[32].mxu1 %v1610_v0 }
 0x169   :  { %1241 = vmatprep.mubr.bf16.mxu1 %v1624_v31 }
 0x170   :  { %1242 = vmatmul.mubr.bf16.gmra.mrb[36].mxu1 %v1622_v28 }
 0x171   :  { %1245 = vmatprep.mubr.bf16.mxu1 %v479_v60 }
 0x178   :  { %1246 = vmatmul.mubr.bf16.gmra.mrb[40].mxu1 %v480_v57 }
 0x179   :  { %1249 = vmatprep.mubr.bf16.mxu1 %v481_v25 }
 0x180   :  { %1250 = vmatmul.mubr.bf16.gmra.mrb[44].mxu1 %v482_v23 }
 0x21b   :  { %v1223_v0 = vpop.f32.mrb[16].mxu1 }
 0x21c   :  { %v595_v27 = vadd.f32 %v1223_v0, %v1649_v3  ;;  %v586_v29 = vpop.f32.mrb[17].mxu1 }
 0x21d   :  { %v587_v28 = vadd.f32 %v1649_v3, %v586_v29  ;;  %v1224_v30 = vpop.f32.mrb[18].mxu1 }
 0x21e   :  { %v598_v31 = vadd.f32 %v1224_v30, %v1649_v3  ;;  %v589_v32 = vpop.f32.mrb[19].mxu1  ;;  %v715_v34 = vmax.f32 %v595_v27, 0.0 }
 0x21f   :  { %v590_v33 = vadd.f32 %v1649_v3, %v589_v32  ;;  %v713_v36 = vmax.f32 %v587_v28, 0.0 }
 0x220   :  { %v716_v35 = vmax.f32 %v598_v31, 0.0 }
 0x221   :  { %v714_v37 = vmax.f32 %v590_v33, 0.0 }
 0x222   :  { %v746_v39 = vpack.c.bf16 %v716_v35, %v715_v34 }
 0x223   :  { %v745_v40 = vpack.c.bf16 %v714_v37, %v713_v36  ;;  %v1227_v41 = vpop.f32.mrb[20].mxu1 }
 0x224   :  { %v611_v42 = vadd.f32 %v1227_v41, %v1649_v3  ;;  %v602_v43 = vpop.f32.mrb[21].mxu1 }
 0x225   :  { %v603_v44 = vadd.f32 %v1649_v3, %v602_v43  ;;  %v1228_v45 = vpop.f32.mrb[22].mxu1  ;;  %1269 = vmatprep.mubr.bf16.mxu0 %v745_v40 }
 0x226   :  { %v614_v46 = vadd.f32 %v1228_v45, %v1649_v3  ;;  %v605_v47 = vpop.f32.mrb[23].mxu1  ;;  %1270 = vmatmul.mubr.bf16.vlgmr.msra.gmra.mrb[16].mxu0 %v746_v39  ;;  %v719_v49 = vmax.f32 %v611_v42, 0.0 }
 0x227   :  { %v606_v48 = vadd.f32 %v1649_v3, %v605_v47  ;;  %v717_v51 = vmax.f32 %v603_v44, 0.0 }
 0x228   :  { %v720_v50 = vmax.f32 %v614_v46, 0.0 }
 0x229   :  { %v718_v52 = vmax.f32 %v606_v48, 0.0 }
 0x22a   :  { %v748_v53 = vpack.c.bf16 %v720_v50, %v719_v49 }
 0x22b   :  { %v747_v54 = vpack.c.bf16 %v718_v52, %v717_v51  ;;  %v1231_v55 = vpop.f32.mrb[24].mxu1 }
 0x22c   :  { %v627_v56 = vadd.f32 %v1231_v55, %v1649_v3  ;;  %v618_v57 = vpop.f32.mrb[25].mxu1 }
 0x22d   :  { %v619_v58 = vadd.f32 %v1649_v3, %v618_v57  ;;  %v1232_v59 = vpop.f32.mrb[26].mxu1  ;;  %1273 = vmatprep.mubr.bf16.mxu0 %v747_v54 }
 0x22e   :  { %v630_v60 = vadd.f32 %v1232_v59, %v1649_v3  ;;  %v621_v61 = vpop.f32.mrb[27].mxu1  ;;  %1274 = vmatmul.mubr.bf16.gmra.mrb[20].mxu0 %v748_v53  ;;  %v723_v63 = vmax.f32 %v627_v56, 0.0 }
 0x22f   :  { %v622_v62 = vadd.f32 %v1649_v3, %v621_v61  ;;  %v721_v2 = vmax.f32 %v619_v58, 0.0 }
 0x230   :  { %v724_v1 = vmax.f32 %v630_v60, 0.0 }
 0x231   :  { %v722_v4 = vmax.f32 %v622_v62, 0.0 }
 0x232   :  { %v750_v5 = vpack.c.bf16 %v724_v1, %v723_v63 }
 0x233   :  { %v749_v6 = vpack.c.bf16 %v722_v4, %v721_v2  ;;  %v1235_v7 = vpop.f32.mrb[28].mxu1 }
 0x234   :  { %v643_v8 = vadd.f32 %v1235_v7, %v1649_v3  ;;  %v634_v9 = vpop.f32.mrb[29].mxu1 }
 0x235   :  { %v635_v10 = vadd.f32 %v1649_v3, %v634_v9  ;;  %v1236_v11 = vpop.f32.mrb[30].mxu1  ;;  %1277 = vmatprep.mubr.bf16.mxu0 %v749_v6 }
 0x236   :  { %v646_v12 = vadd.f32 %v1236_v11, %v1649_v3  ;;  %v637_v13 = vpop.f32.mrb[31].mxu1  ;;  %1278 = vmatmul.mubr.bf16.gmra.mrb[24].mxu0 %v750_v5  ;;  %v727_v15 = vmax.f32 %v643_v8, 0.0 }
 0x237   :  { %v638_v14 = vadd.f32 %v1649_v3, %v637_v13  ;;  %v725_v17 = vmax.f32 %v635_v10, 0.0 }
 0x238   :  { %v728_v16 = vmax.f32 %v646_v12, 0.0 }
 0x239   :  { %v726_v18 = vmax.f32 %v638_v14, 0.0  ;;  %v1686_v14 = vld [vmem:[%s1736_s4 + $0x2] ss:$0 sm:$0xff]  ;;  %s1490_s4 = smov [#allocation10]  }
 0x23a   :  { %v752_v19 = vpack.c.bf16 %v728_v16, %v727_v15  ;;  %s1028_s19 = sshll.u32 %s1490_s4, 4  ;;  %s1029_s19 = int_to_ptr.vmem [resolvable:$true] %s1028_s19 }
 0x23b   :  { %v751_v20 = vpack.c.bf16 %v726_v18, %v725_v17  ;;  %v1239_v21 = vpop.f32.mrb[32].mxu1  ;;  %s1454_s20 = scalar_lea.vmem %s1029_s19, 4096  ;;  %p1459_p5 = scmp.lt.s32.totalorder %s1029_s19, %s1029_s19 }
 0x23c   :  { %v659_v22 = vadd.f32 %v1239_v21, %v1649_v3  ;;  %v650_v23 = vpop.f32.mrb[33].mxu1  ;;  %p1455_p4 = scmp.ne.s32.totalorder %s1029_s19, %s1454_s20  ;;  %p1460_p6 = scmp.lt.s32.totalorder %s1454_s20, %s1454_s20 }
 0x23d   :  { %v651_v24 = vadd.f32 %v1649_v3, %v650_v23  ;;  %v1240_v25 = vpop.f32.mrb[34].mxu1  ;;  %1281 = vmatprep.mubr.bf16.mxu0 %v751_v20 }
 0x23e   :  { %v662_v38 = vadd.f32 %v1240_v25, %v1649_v3  ;;  %v653_v26 = vpop.f32.mrb[35].mxu1  ;;  %1282 = vmatmul.mubr.bf16.gmra.mrb[28].mxu0 %v752_v19  ;;  %v731_v27 = vmax.f32 %v659_v22, 0.0  ;;  %p1461_p7 = por %p1460_p6, %p1459_p5 }
 0x23f   :  { %v654_v0 = vadd.f32 %v1649_v3, %v653_v26  ;;  %v729_v28 = vmax.f32 %v651_v24, 0.0 }
 0x240   :  { %v732_v29 = vmax.f32 %v662_v38, 0.0  ;;  %p1462_p8 = pnand %p1461_p7, %p1455_p4 }
 0x241   :  { %v730_v30 = vmax.f32 %v654_v0, 0.0 }
 0x242   :  { %v754_v31 = vpack.c.bf16 %v732_v29, %v731_v27 }
 0x243   :  { %v753_v32 = vpack.c.bf16 %v730_v30, %v729_v28  ;;  %v1243_v33 = vpop.f32.mrb[36].mxu1 }
 0x244   :  { %v675_v34 = vadd.f32 %v1243_v33, %v1649_v3  ;;  %v666_v35 = vpop.f32.mrb[37].mxu1 }
 0x245   :  { %v667_v36 = vadd.f32 %v1649_v3, %v666_v35  ;;  %v1244_v37 = vpop.f32.mrb[38].mxu1  ;;  %1285 = vmatprep.mubr.bf16.mxu0 %v753_v32 }
 0x246   :  { %v678_v39 = vadd.f32 %v1244_v37, %v1649_v3  ;;  %v669_v40 = vpop.f32.mrb[39].mxu1  ;;  %1286 = vmatmul.mubr.bf16.gmra.mrb[32].mxu0 %v754_v31  ;;  %v735_v42 = vmax.f32 %v675_v34, 0.0 }
 0x247   :  { %v670_v41 = vadd.f32 %v1649_v3, %v669_v40  ;;  %v733_v44 = vmax.f32 %v667_v36, 0.0 }
 0x248   :  { %v736_v43 = vmax.f32 %v678_v39, 0.0 }
 0x249   :  { %v734_v45 = vmax.f32 %v670_v41, 0.0 }
 0x24a   :  { %v756_v46 = vpack.c.bf16 %v736_v43, %v735_v42 }
 0x24b   :  { %v755_v47 = vpack.c.bf16 %v734_v45, %v733_v44  ;;  %v1247_v48 = vpop.f32.mrb[40].mxu1 }
 0x24c   :  { %v691_v49 = vadd.f32 %v1247_v48, %v1649_v3  ;;  %v682_v50 = vpop.f32.mrb[41].mxu1 }
 0x24d   :  { %v683_v51 = vadd.f32 %v1649_v3, %v682_v50  ;;  %v1248_v52 = vpop.f32.mrb[42].mxu1  ;;  %1289 = vmatprep.mubr.bf16.mxu0 %v755_v47 }
 0x24e   :  { %v694_v53 = vadd.f32 %v1248_v52, %v1649_v3  ;;  %v685_v54 = vpop.f32.mrb[43].mxu1  ;;  %1290 = vmatmul.mubr.bf16.gmra.mrb[36].mxu0 %v756_v46  ;;  %v739_v56 = vmax.f32 %v691_v49, 0.0 }
 0x24f   :  { %v686_v55 = vadd.f32 %v1649_v3, %v685_v54  ;;  %v737_v58 = vmax.f32 %v683_v51, 0.0 }
 0x250   :  { %v740_v57 = vmax.f32 %v694_v53, 0.0 }
 0x251   :  { %v738_v59 = vmax.f32 %v686_v55, 0.0 }
 0x252   :  { %v758_v60 = vpack.c.bf16 %v740_v57, %v739_v56 }
 0x253   :  { %v757_v61 = vpack.c.bf16 %v738_v59, %v737_v58  ;;  %v1251_v62 = vpop.f32.mrb[44].mxu1 }
 0x254   :  { %v707_v63 = vadd.f32 %v1251_v62, %v1649_v3  ;;  %v698_v1 = vpop.f32.mrb[45].mxu1 }
 0x255   :  { %v699_v2 = vadd.f32 %v1649_v3, %v698_v1  ;;  %v1252_v4 = vpop.f32.mrb[46].mxu1  ;;  %1293 = vmatprep.mubr.bf16.mxu0 %v757_v61 }
 0x256   :  { %v710_v5 = vadd.f32 %v1252_v4, %v1649_v3  ;;  %v701_v6 = vpop.f32.mrb[47].mxu1  ;;  %1294 = vmatmul.mubr.bf16.gmra.mrb[40].mxu0 %v758_v60  ;;  %v743_v8 = vmax.f32 %v707_v63, 0.0 }
 0x257   :  { %v702_v7 = vadd.f32 %v1649_v3, %v701_v6  ;;  %v741_v10 = vmax.f32 %v699_v2, 0.0 }
 0x258   :  { %v744_v9 = vmax.f32 %v710_v5, 0.0 }
 0x259   :  { %v742_v11 = vmax.f32 %v702_v7, 0.0 }
 0x25a   :  { %v760_v12 = vpack.c.bf16 %v744_v9, %v743_v8 }
 0x25b   :  { %v759_v13 = vpack.c.bf16 %v742_v11, %v741_v10 }
 0x25d   :  { %1297 = vmatprep.mubr.bf16.mxu0 %v759_v13 }
 0x25e   :  { %1298 = vmatmul.mubr.bf16.gmra.mrb[44].mxu0 %v760_v12 }
 0x2f9   :  { %v1271_v15 = vpop.f32.mrb[16].mxu0 }
 0x2fa   :  { %v873_v16 = vadd.f32 %v1271_v15, %v1686_v14  ;;  %v864_v17 = vpop.f32.mrb[17].mxu0 }
 0x2fb   :  { %v865_v18 = vadd.f32 %v1686_v14, %v864_v17  ;;  %v1272_v3 = vpop.f32.mrb[18].mxu0 }
 0x2fc   :  { %993 = vst [vmem:[#allocation10 + $0x10] sm:$0xff] %v873_v16  ;;  %v876_v19 = vadd.f32 %v1272_v3, %v1686_v14  ;;  %v867_v20 = vpop.f32.mrb[19].mxu0 }
 0x2fd   :  { %991 = vst [vmem:[#allocation10] sm:$0xff] %v865_v18  ;;  %v868_v21 = vadd.f32 %v1686_v14, %v867_v20 }
 0x2fe   :  { %994 = vst [vmem:[#allocation10 + $0x18] sm:$0xff] %v876_v19 }
 0x2ff   :  { %992 = vst [vmem:[#allocation10 + $0x8] sm:$0xff] %v868_v21 }
 0x301   :  { %v1275_v22 = vpop.f32.mrb[20].mxu0 }
 0x302   :  { %v889_v23 = vadd.f32 %v1275_v22, %v1686_v14  ;;  %v880_v24 = vpop.f32.mrb[21].mxu0 }
 0x303   :  { %v881_v25 = vadd.f32 %v1686_v14, %v880_v24  ;;  %v1276_v38 = vpop.f32.mrb[22].mxu0 }
 0x304   :  { %997 = vst [vmem:[#allocation10 + $0x30] sm:$0xff] %v889_v23  ;;  %v892_v26 = vadd.f32 %v1276_v38, %v1686_v14  ;;  %v883_v0 = vpop.f32.mrb[23].mxu0 }
 0x305   :  { %995 = vst [vmem:[#allocation10 + $0x20] sm:$0xff] %v881_v25  ;;  %v884_v27 = vadd.f32 %v1686_v14, %v883_v0 }
 0x306   :  { %998 = vst [vmem:[#allocation10 + $0x38] sm:$0xff] %v892_v26 }
 0x307   :  { %996 = vst [vmem:[#allocation10 + $0x28] sm:$0xff] %v884_v27 }
 0x309   :  { %v1279_v29 = vpop.f32.mrb[24].mxu0 }
 0x30a   :  { %v905_v28 = vadd.f32 %v1279_v29, %v1686_v14  ;;  %v896_v30 = vpop.f32.mrb[25].mxu0 }
 0x30b   :  { %v897_v31 = vadd.f32 %v1686_v14, %v896_v30  ;;  %v1280_v32 = vpop.f32.mrb[26].mxu0 }
 0x30c   :  { %1001 = vst [vmem:[#allocation10 + $0x50] sm:$0xff] %v905_v28  ;;  %v908_v33 = vadd.f32 %v1280_v32, %v1686_v14  ;;  %v899_v34 = vpop.f32.mrb[27].mxu0 }
 0x30d   :  { %999 = vst [vmem:[#allocation10 + $0x40] sm:$0xff] %v897_v31  ;;  %v900_v35 = vadd.f32 %v1686_v14, %v899_v34 }
 0x30e   :  { %1002 = vst [vmem:[#allocation10 + $0x58] sm:$0xff] %v908_v33 }
 0x30f   :  { %1000 = vst [vmem:[#allocation10 + $0x48] sm:$0xff] %v900_v35 }
 0x311   :  { %v1283_v36 = vpop.f32.mrb[28].mxu0 }
 0x312   :  { %v921_v37 = vadd.f32 %v1283_v36, %v1686_v14  ;;  %v912_v39 = vpop.f32.mrb[29].mxu0 }
 0x313   :  { %v913_v40 = vadd.f32 %v1686_v14, %v912_v39  ;;  %v1284_v41 = vpop.f32.mrb[30].mxu0 }
 0x314   :  { %1005 = vst [vmem:[#allocation10 + $0x70] sm:$0xff] %v921_v37  ;;  %v924_v42 = vadd.f32 %v1284_v41, %v1686_v14  ;;  %v915_v43 = vpop.f32.mrb[31].mxu0 }
 0x315   :  { %1003 = vst [vmem:[#allocation10 + $0x60] sm:$0xff] %v913_v40  ;;  %v916_v44 = vadd.f32 %v1686_v14, %v915_v43 }
 0x316   :  { %1006 = vst [vmem:[#allocation10 + $0x78] sm:$0xff] %v924_v42 }
 0x317   :  { %1004 = vst [vmem:[#allocation10 + $0x68] sm:$0xff] %v916_v44 }
 0x319   :  { %v1287_v45 = vpop.f32.mrb[32].mxu0 }
 0x31a   :  { %v937_v46 = vadd.f32 %v1287_v45, %v1686_v14  ;;  %v928_v47 = vpop.f32.mrb[33].mxu0 }
 0x31b   :  { %v929_v48 = vadd.f32 %v1686_v14, %v928_v47  ;;  %v1288_v49 = vpop.f32.mrb[34].mxu0 }
 0x31c   :  { %1009 = vst [vmem:[#allocation10 + $0x90] sm:$0xff] %v937_v46  ;;  %v940_v50 = vadd.f32 %v1288_v49, %v1686_v14  ;;  %v931_v51 = vpop.f32.mrb[35].mxu0 }
 0x31d   :  { %1007 = vst [vmem:[#allocation10 + $0x80] sm:$0xff] %v929_v48  ;;  %v932_v52 = vadd.f32 %v1686_v14, %v931_v51 }
 0x31e   :  { %1010 = vst [vmem:[#allocation10 + $0x98] sm:$0xff] %v940_v50 }
 0x31f   :  { %1008 = vst [vmem:[#allocation10 + $0x88] sm:$0xff] %v932_v52 }
 0x321   :  { %v1291_v53 = vpop.f32.mrb[36].mxu0 }
 0x322   :  { %v953_v54 = vadd.f32 %v1291_v53, %v1686_v14  ;;  %v944_v55 = vpop.f32.mrb[37].mxu0 }
 0x323   :  { %v945_v56 = vadd.f32 %v1686_v14, %v944_v55  ;;  %v1292_v57 = vpop.f32.mrb[38].mxu0 }
 0x324   :  { %1013 = vst [vmem:[#allocation10 + $0xb0] sm:$0xff] %v953_v54  ;;  %v956_v58 = vadd.f32 %v1292_v57, %v1686_v14  ;;  %v947_v59 = vpop.f32.mrb[39].mxu0 }
 0x325   :  { %1011 = vst [vmem:[#allocation10 + $0xa0] sm:$0xff] %v945_v56  ;;  %v948_v60 = vadd.f32 %v1686_v14, %v947_v59 }
 0x326   :  { %1014 = vst [vmem:[#allocation10 + $0xb8] sm:$0xff] %v956_v58 }
 0x327   :  { %1012 = vst [vmem:[#allocation10 + $0xa8] sm:$0xff] %v948_v60 }
 0x329   :  { %v1295_v61 = vpop.f32.mrb[40].mxu0 }
 0x32a   :  { %v969_v62 = vadd.f32 %v1295_v61, %v1686_v14  ;;  %v960_v63 = vpop.f32.mrb[41].mxu0 }
 0x32b   :  { %v961_v1 = vadd.f32 %v1686_v14, %v960_v63  ;;  %v1296_v2 = vpop.f32.mrb[42].mxu0 }
 0x32c   :  { %1017 = vst [vmem:[#allocation10 + $0xd0] sm:$0xff] %v969_v62  ;;  %v972_v4 = vadd.f32 %v1296_v2, %v1686_v14  ;;  %v963_v5 = vpop.f32.mrb[43].mxu0 }
 0x32d   :  { %1015 = vst [vmem:[#allocation10 + $0xc0] sm:$0xff] %v961_v1  ;;  %v964_v6 = vadd.f32 %v1686_v14, %v963_v5 }
 0x32e   :  { %1018 = vst [vmem:[#allocation10 + $0xd8] sm:$0xff] %v972_v4 }
 0x32f   :  { %1016 = vst [vmem:[#allocation10 + $0xc8] sm:$0xff] %v964_v6 }
 0x331   :  { %v1299_v7 = vpop.f32.mrb[44].mxu0 }
 0x332   :  { %v985_v8 = vadd.f32 %v1299_v7, %v1686_v14  ;;  %v976_v9 = vpop.f32.mrb[45].mxu0 }
 0x333   :  { %v977_v10 = vadd.f32 %v1686_v14, %v976_v9  ;;  %v1300_v11 = vpop.f32.mrb[46].mxu0 }
 0x334   :  { %1021 = vst [vmem:[#allocation10 + $0xf0] sm:$0xff] %v985_v8  ;;  %v988_v12 = vadd.f32 %v1300_v11, %v1686_v14  ;;  %v979_v13 = vpop.f32.mrb[47].mxu0 }
 0x335   :  { %1019 = vst [vmem:[#allocation10 + $0xe0] sm:$0xff] %v977_v10  ;;  %v980_v15 = vadd.f32 %v1686_v14, %v979_v13 }
 0x336   :  { %1022 = vst [vmem:[#allocation10 + $0xf8] sm:$0xff] %v988_v12 }
 0x337   :  { %1020 = vst [vmem:[#allocation10 + $0xe8] sm:$0xff] %v980_v15 }
 0x338   :  { %1465 = shalt.err (!%p1462_p8)
}
 0x339   :  { %s1466_s24 = scalar_lea.hbm %s1737_s5, 4096 }
 0x33a   :  { %p1467_p9 = scmp.ne.s32.totalorder %s1737_s5, %s1466_s24  ;;  %p1470_p10 = scmp.lt.u32.totalorder %s1466_s24, %s1737_s5 }
 0x33c   :  { %p1472_p11 = pnand %p1470_p10, %p1467_p9 }
 0x33e   :  { %1475 = shalt.err (!%p1472_p11)
}
 0x33f   :  { %s1491_s29 = smov 128   ;;  %s1492_s0 = smov 8  }
 0x340   :  { %1034 = dma.vmem_to_hbm [thread:$0]  %s1029_s19, 4096, %s1737_s5, [#allocation4], %s1491_s29, %s1491_s29, %s1492_s0  }
 0x341   :  { %1482 = dma.done.wait [#allocation4], 4096  }
 0x342   :  { %1483 = vsyncadd [#allocation4], 4294963200 }
 0x343   :  { %1038 = vsyncpa [#allocation3], 1 }
 0x344   :  { %1039 = vsyncpa [#allocation6], 1 }
 0x345   :  { %1040 = vsyncpa [#allocation9], 1 }
 0x346   :  { %1041 = vsyncpa [#allocation4], 1 }

</bundles_post_ra>
